<compile_context>
chip_gen: v7x
topology: tpu7x:2x2x1
jax: 0.10.0
libtpu: 0.0.40
codegen_flags: <defaults>
</compile_context>

<pallas_src>
import jax
import jax.numpy as jnp
from jax.experimental import pallas as pl
from jax.experimental.pallas import tpu as pltpu

_TILE_BYTES = 4 * 1024 * 1024   # per (TB, TF) block; ~16 MiB double-buffered in+out
_VMEM_LIMIT = 32 * 1024 * 1024  # raise v5e's 16 MiB default; safe on v6e/v7x too


def _drop_path_kernel(x_ref, scale_ref, o_ref):
    # x_ref: (TB, TF) in x dtype; scale_ref: (TB, 1) f32.
    # Multiply promotes to f32 (no double-rounded 1/keep_prob), cast on store.
    o_ref[...] = (x_ref[...] * scale_ref[...]).astype(o_ref.dtype)


def _pick_tiles(batch: int, feat: int, itemsize: int):
    """Pick (TB, TF) with TB*TF*itemsize <= _TILE_BYTES.

    TF is the full feature dim if it fits, else a multiple of 128.
    TB is the full batch dim or a multiple of 8 (sublane aligned).
    Callers guarantee feat % 128 == 0 when TF < feat.
    """
    if feat * itemsize <= _TILE_BYTES:
        tf = feat
    else:
        tf = max(128, (_TILE_BYTES // itemsize // 128) * 128)
        tf = min(tf, (feat // 128) * 128)

    row_bytes = tf * itemsize
    target_rows = max(1, _TILE_BYTES // max(1, row_bytes))
    if target_rows >= batch:
        tb = batch
    else:
        tb = min(batch, max(8, (target_rows // 8) * 8))
    return tb, tf


def drop_path(x, drop_prob: float = 0.0, training: bool = False,
              key=None, seed: int = 0):
    """Pallas DropPath. x: (B, ...) -- per-sample drop, broadcast over the rest.

    NOTE: if `key` is None a fixed PRNGKey(seed) is used, which repeats the
    same drop pattern every call; real training loops should thread fresh keys.
    """
    if drop_prob == 0.0 or not training:
        return x
    if drop_prob >= 1.0:
        # keep_prob == 0 would give 0 * inf = NaN; every sample is dropped.
        return jnp.zeros_like(x)

    keep_prob = 1.0 - drop_prob
    if key is None:
        key = jax.random.PRNGKey(seed)

    orig_shape = x.shape
    B = orig_shape[0]
    F = 1
    for d in orig_shape[1:]:
        F *= d

    # Per-sample mask, identical semantics to torch: floor(keep_prob + U[0,1)).
    u = jax.random.uniform(key, (B,), dtype=jnp.float32)
    mask = jnp.floor(keep_prob + u)                       # 0.0 or 1.0
    scale = mask * jnp.float32(1.0 / keep_prob)           # (B,), f32

    # Lane-density guard: sub-128 / non-128-multiple feature dims would force
    # masked partial stores -- just let XLA handle tiny / odd shapes.
    if F < 128 or (F % 128) != 0:
        bshape = (B,) + (1,) * (x.ndim - 1)
        return (x * scale.reshape(bshape).astype(jnp.float32)).astype(x.dtype)

    x2d = x.reshape(B, F)
    scale2d = scale.reshape(B, 1)

    itemsize = x2d.dtype.itemsize
    TB, TF = _pick_tiles(B, F, itemsize)
    grid = (pl.cdiv(B, TB), pl.cdiv(F, TF))

    out2d = pl.pallas_call(
        _drop_path_kernel,
        out_shape=jax.ShapeDtypeStruct((B, F), x.dtype),
        grid=grid,
        in_specs=[
            pl.BlockSpec((TB, TF), lambda i, j: (i, j)),  # activations
            pl.BlockSpec((TB, 1), lambda i, j: (i, 0)),   # per-sample scale (f32)
        ],
        out_specs=pl.BlockSpec((TB, TF), lambda i, j: (i, j)),
        compiler_params=pltpu.CompilerParams(
            # independent tiles in both axes -> megacore can shard either one
            dimension_semantics=("parallel", "parallel"),
            vmem_limit_bytes=_VMEM_LIMIT,
        ),
        cost_estimate=pl.CostEstimate(
            flops=B * F,
            transcendentals=0,
            bytes_accessed=2 * B * F * itemsize + B * 4,
        ),
        # If the caller no longer needs x, input_output_aliases={0: 0} would
        # drop one B*F HBM allocation; not enabled by default since DropPath
        # callers usually still hold the residual input.
    )(x2d, scale2d)

    return out2d.reshape(orig_shape)


class DropPath:
    """Mirror of the PyTorch DropPath module (forward only)."""

    def __init__(self, drop_prob=None):
        self.drop_prob = drop_prob if drop_prob is not None else 0.0
        self.training = True

    def __call__(self, x, key=None, seed: int = 0):
        return drop_path(x, self.drop_prob, self.training, key=key, seed=seed)


if __name__ == "__main__":
    key = jax.random.PRNGKey(0)
    xkey, dkey = jax.random.split(key)

    # Small ViT-like shapes: batch, tokens, hidden (F = 8*32 = 256, lane-dense).
    B, N, D = 2, 8, 32
    x = jax.random.normal(xkey, (B, N, D), dtype=jnp.float32)

    keep_prob = 1.0 - 0.25
    module = DropPath(drop_prob=0.25)
    module.training = True
    out = jax.block_until_ready(module(x, key=dkey))

    # Sanity: each sample is either exactly zero or x / keep_prob.
    for b in range(B):
        sample = out[b]
        is_zero = bool(jnp.all(sample == 0.0))
        is_scaled = bool(jnp.allclose(sample, x[b] / keep_prob, rtol=1e-5, atol=1e-6))
        assert is_zero or is_scaled, "DropPath output does not match semantics"

    # Eval mode is identity.
    module.training = False
    out_eval = jax.block_until_ready(module(x, key=dkey))
    assert bool(jnp.allclose(out_eval, x)), "eval mode must be identity"

    # Fallback path (feature dim not a multiple of 128) keeps semantics.
    module.training = True
    x_odd = jax.random.normal(xkey, (B, 5, 20), dtype=jnp.float32)
    out_odd = jax.block_until_ready(module(x_odd, key=dkey))
    for b in range(B):
        s = out_odd[b]
        ok = bool(jnp.all(s == 0.0)) or bool(
            jnp.allclose(s, x_odd[b] / keep_prob, rtol=1e-5, atol=1e-6))
        assert ok, "fallback path output does not match semantics"

    # drop_prob == 1.0 must give zeros, not NaN.
    module_all = DropPath(drop_prob=1.0)
    module_all.training = True
    out_all = jax.block_until_ready(module_all(x, key=dkey))
    assert bool(jnp.all(out_all == 0.0)), "drop_prob=1.0 must zero everything"

    print("KERNEL_OK")
</pallas_src>

<mosaic_0001>
module attributes {stable_mosaic.version = 11 : i64} {
  func.func @_drop_path_kernel(%arg0: i32, %arg1: i32, %arg2: memref<2x256xf32, #tpu.memory_space<vmem>>, %arg3: memref<2x1xf32, #tpu.memory_space<vmem>>, %arg4: memref<2x256xf32, #tpu.memory_space<vmem>>) attributes {dimension_semantics = [#tpu.dimension_semantics<parallel>, #tpu.dimension_semantics<parallel>], iteration_bounds = array<i64: 1, 1>, scalar_prefetch = 0 : i64, scratch_operands = 0 : i64, tpu.core_type = #tpu.core_type<tc>, window_params = [{transform_indices = @transform_0, window_bounds = array<i64: 2, 256>}, {transform_indices = @transform_1, window_bounds = array<i64: 2, 1>}, {transform_indices = @transform_2, window_bounds = array<i64: 2, 256>}]} {
    %c0 = arith.constant 0 : index
    %c0_0 = arith.constant 0 : index
    %0 = vector.load %arg2[%c0, %c0_0] : memref<2x256xf32, #tpu.memory_space<vmem>>, vector<2x256xf32>
    %c0_1 = arith.constant 0 : index
    %c0_2 = arith.constant 0 : index
    %1 = vector.load %arg3[%c0_1, %c0_2] : memref<2x1xf32, #tpu.memory_space<vmem>>, vector<2x1xf32>
    %2 = vector.broadcast %1 : vector<2x1xf32> to vector<2x256xf32>
    %3 = arith.mulf %0, %2 : vector<2x256xf32>
    %c0_3 = arith.constant 0 : index
    %c0_4 = arith.constant 0 : index
    %4 = vector.load %arg4[%c0_3, %c0_4] : memref<2x256xf32, #tpu.memory_space<vmem>>, vector<2x256xf32>
    tpu.vector_store %arg4[%c0_3, %c0_4], %3 {strides = array<i32>} : memref<2x256xf32, #tpu.memory_space<vmem>>, vector<2x256xf32>,
    return
  }
  func.func @transform_0(%arg0: i32, %arg1: i32) -> (i32, i32) {
    %c0_i32 = arith.constant 0 : i32
    return %arg0, %arg1 : i32, i32
  }
  func.func @transform_1(%arg0: i32, %arg1: i32) -> (i32, i32) {
    %c0_i32 = arith.constant 0 : i32
    %c0_i32_0 = arith.constant 0 : i32
    return %arg0, %c0_i32 : i32, i32
  }
  func.func @transform_2(%arg0: i32, %arg1: i32) -> (i32, i32) {
    %c0_i32 = arith.constant 0 : i32
    return %arg0, %arg1 : i32, i32
  }
}

</mosaic_0001>

<bundles_post_ra>
// kernel: tpu_custom_call.1
= control target key start
LH: loop header
LB: loop body
LE: loop exit
PB: predicated region body
PF: predicated region fallthrough
CT: control target
= control target key end

     0   :  { %7 = vsyncpa [#allocation3], 0  ;;  %s154_s0 = inlined_call_operand.hbm [shape: f32[2,256], index: 0, kind: input, shape index: {}]   ;;  %s155_s1 = inlined_call_operand.vmem [shape: f32[2,1], index: 1, kind: input, shape index: {}]   ;;  %s156_s2 = inlined_call_operand.hbm [shape: f32[2,256], index: 2, kind: output, shape index: {}]  }
   0x1   :  { %8 = vsyncpa [#allocation4], 0  ;;  %s108_s9 = smov [#allocation2]   ;;  %s60_s13 = scalar_lea.hbm %s154_s0, 64 }
   0x2   :  { %s15_s10 = sshll.u32 %s108_s9, 4  ;;  %p61_p0 = scmp.ne.s32.totalorder %s154_s0, %s60_s13  ;;  %s16_s10 = int_to_ptr.vmem [resolvable:$true] %s15_s10 }
   0x3   :  { %p64_p1 = scmp.lt.u32.totalorder %s60_s13, %s154_s0 }
   0x5   :  { %p66_p2 = pnand %p64_p1, %p61_p0 }
   0x7   :  { %69 = shalt.err (!%p66_p2)
}
   0x8   :  { %s70_s18 = scalar_lea.vmem %s16_s10, 64  ;;  %p75_p4 = scmp.lt.s32.totalorder %s16_s10, %s16_s10 }
   0x9   :  { %p71_p3 = scmp.ne.s32.totalorder %s16_s10, %s70_s18  ;;  %p76_p5 = scmp.lt.s32.totalorder %s70_s18, %s70_s18 }
   0xb   :  { %p77_p6 = por %p76_p5, %p75_p4 }
   0xd   :  { %p78_p7 = pnand %p77_p6, %p71_p3 }
   0xf   :  { %81 = shalt.err (!%p78_p7)
}
  0x10   :  { %18 = dma.hbm_to_vmem [thread:$0]  %s154_s0, 64, %s16_s10, [#allocation3]  }
  0x11   :  { %104 = dma.done.wait [#allocation3], 64  }
  0x12   :  { %105 = vsyncadd [#allocation3], 4294967232  ;;  %v109_v0 = vmov 0   ;;  %v25_v1 = vld [vmem:[%s155_s1] sm:$0x3]  ;;  %v33_v4 = vlaneseq  ;;  %s111_s23 = smov [#allocation5]  }
  0x13   :  { %59 = vset.pattern.permute.xlu0 %v109_v0  ;;  %v110_v2 = vmov 269488144   ;;  %v24_v9 = vld [vmem:[#allocation2] sm:$0xf]  ;;  %s46_s24 = sshll.u32 %s111_s23, 4  ;;  %s47_s24 = int_to_ptr.vmem [resolvable:$true] %s46_s24 }
  0x14   :  { %28 = vperm.xlu0 %59, %v25_v1   ;;  %v31_v3 = vunpack.c.l.s4 %v110_v2  ;;  %v34_v6 = vshrl.u32 %v33_v4, 7  ;;  %s82_s0 = scalar_lea.vmem %s47_s24, 64  ;;  %p87_p9 = scmp.lt.s32.totalorder %s47_s24, %s47_s24 }
  0x15   :  { %p83_p8 = scmp.ne.s32.totalorder %s47_s24, %s82_s0  ;;  %p88_p10 = scmp.lt.s32.totalorder %s82_s0, %s82_s0 }
  0x16   :  { %v32_v5 = vunpack.c.0.s8 %v31_v3 }
  0x17   :  { %p89_p11 = por %p88_p10, %p87_p9 }
  0x18   :  { %v35_v7 = vsub.s32 %v32_v5, %v34_v6 }
  0x19   :  { %p90_p12 = pnand %p89_p11, %p83_p8 }
  0x93   :  { %v29_v8 = vpop.permute.xlu0 %28 }
  0x94   :  { %v36_v10 = vrot.slane %v29_v8, %v35_v7 }
  0x96   :  { %v38_v11 = vmul.f32 %v36_v10, %v24_v9 }
  0x98   :  { %39 = vst [vmem:[#allocation5] sm:$0xf] %v38_v11 }
  0x99   :  { %93 = shalt.err (!%p90_p12)
}
  0x9a   :  { %s94_s26 = scalar_lea.hbm %s156_s2, 64 }
  0x9b   :  { %p95_p13 = scmp.ne.s32.totalorder %s156_s2, %s94_s26  ;;  %p98_p0 = scmp.lt.u32.totalorder %s94_s26, %s156_s2 }
  0x9d   :  { %p100_p1 = pnand %p98_p0, %p95_p13 }
  0x9f   :  { %103 = shalt.err (!%p100_p1)
}
  0xa0   :  { %49 = dma.vmem_to_hbm [thread:$0]  %s47_s24, 64, %s156_s2, [#allocation4]  }
  0xa1   :  { %106 = dma.done.wait [#allocation4], 64  }
  0xa2   :  { %107 = vsyncadd [#allocation4], 4294967232 }
  0xa3   :  { %53 = vsyncpa [#allocation3], 1 }
  0xa4   :  { %54 = vsyncpa [#allocation4], 1 }

</bundles_post_ra>
